<compile_context>
chip_gen: v7x
topology: tpu7x:2x2x1
jax: 0.10.0
libtpu: 0.0.40
codegen_flags: <defaults>
</compile_context>

<pallas_src>
import math

import jax
import jax.numpy as jnp
from jax import lax
from jax.experimental import pallas as pl
from jax.experimental.pallas import tpu as pltpu


def _make_block_kernel(W, has_scale_shift, compute_dtype):
    """Kernel processing ONE image per grid step.

    Refs (in order):
      x_ref    : [Cin, H*W]    input image, spatial flattened onto lanes
      w1_ref   : [3, Ch, Cin]  (1,3) conv weight, per width tap   (compute_dtype)
      w2_ref   : [7, Ch, Cin]  (7,1) conv weight, per height tap  (compute_dtype)
      b_ref    : [Cout, 1]     concatenated conv bias (f32)
      g_ref    : [Cout, 1]     RMSNorm gain * sqrt(Cout) (f32)
      [scale_ref, shift_ref : [Cout, 1]]   (only if has_scale_shift)
      out_ref  : [Cout, H*W]
    """

    def kernel(*refs):
        if has_scale_shift:
            (x_ref, w1_ref, w2_ref, b_ref, g_ref,
             scale_ref, shift_ref, out_ref) = refs
        else:
            x_ref, w1_ref, w2_ref, b_ref, g_ref, out_ref = refs
            scale_ref = shift_ref = None

        Cin, HW = x_ref.shape
        Cout = out_ref.shape[0]

        xc = x_ref[...].astype(compute_dtype)                     # [Cin, HW]
        zcol = jnp.zeros((Cin, 1), compute_dtype)
        # Width-tap boundary masks built at (1, HW) and broadcast over channels.
        col = lax.broadcasted_iota(jnp.int32, (1, HW), 1) % W

        # ---- (1,3) conv, padding (0,1): 3 accumulated per-tap matmuls -----------
        y1 = jnp.dot(w1_ref[1], xc, preferred_element_type=jnp.float32)   # d =  0
        xm1 = jnp.concatenate([zcol, xc[:, :HW - 1]], axis=1)             # x[p-1]
        xm1 = jnp.where(col != 0, xm1, jnp.zeros_like(xm1))
        y1 = y1 + jnp.dot(w1_ref[0], xm1, preferred_element_type=jnp.float32)
        xp1 = jnp.concatenate([xc[:, 1:], zcol], axis=1)                  # x[p+1]
        xp1 = jnp.where(col != W - 1, xp1, jnp.zeros_like(xp1))
        y1 = y1 + jnp.dot(w1_ref[2], xp1, preferred_element_type=jnp.float32)

        # ---- (7,1) conv, padding (3,0): 7 accumulated per-tap matmuls -----------
        y2 = jnp.dot(w2_ref[3], xc, preferred_element_type=jnp.float32)   # dh = 0
        for j in range(7):
            dh = j - 3
            if dh == 0 or abs(dh) * W >= HW:     # dh==0 done; tap fully in padding
                continue
            if dh > 0:                            # value at p + dh*W, zero past end
                piece = jnp.concatenate(
                    [xc[:, dh * W:], jnp.zeros((Cin, dh * W), compute_dtype)],
                    axis=1)
            else:                                 # value at p + dh*W, zero before 0
                piece = jnp.concatenate(
                    [jnp.zeros((Cin, -dh * W), compute_dtype), xc[:, :HW + dh * W]],
                    axis=1)
            y2 = y2 + jnp.dot(w2_ref[j], piece, preferred_element_type=jnp.float32)

        # Channel concat (torch.cat((x1, x2), dim=1)) + bias.
        y = jnp.concatenate([y1, y2], axis=0) + b_ref[...]       # [Cout, HW] f32

        # ---- RMSNorm over channels; sum-of-squares on the MXU (idle unit) -------
        ones_row = jnp.ones((1, Cout), jnp.float32)
        ss = jnp.dot(ones_row, y * y, preferred_element_type=jnp.float32)  # [1,HW]
        y = y * lax.rsqrt(jnp.maximum(ss, 1e-24))
        y = y * g_ref[...]

        if has_scale_shift:
            y = y * (scale_ref[...] + 1.0) + shift_ref[...]

        # ---- SiLU + lane-dense store ---------------------------------------------
        y = y * jax.nn.sigmoid(y)
        out_ref[...] = y.astype(out_ref.dtype)

    return kernel


def _vmem_limit_bytes(default=32 * 1024 * 1024):
    """~75% of this generation's physical VMEM (capped), never the full budget."""
    try:
        cap = getattr(pltpu.get_tpu_info(), "vmem_capacity_bytes", None)
        if cap:
            return min((int(cap) * 3) // 4, 96 * 1024 * 1024)
    except Exception:
        pass
    return default


def block_forward(x_nchw, params, scale_shift=None, compute_dtype=jnp.bfloat16):
    """x_nchw: [N, Cin, H, W] -> [N, Cout, H, W] (matches PyTorch Block.forward).

    scale_shift: None, or a (scale, shift) pair shaped (N, Cout, 1, 1) or (N, Cout).
    """
    w1, b1, w2, b2, g = (params["w1"], params["b1"], params["w2"],
                         params["b2"], params["g"])
    N, Cin, H, W = x_nchw.shape
    Ch = b1.shape[0]
    Cout = 2 * Ch
    HW = H * W

    # Per-tap dense weights (no zero blocks anywhere), held in compute_dtype.
    # params store w1: [3, Cin, Ch], w2: [7, Cin, Ch]  ->  [taps, Ch, Cin]
    w1_t = jnp.transpose(w1, (0, 2, 1)).astype(compute_dtype)    # [3, Ch, Cin]
    w2_t = jnp.transpose(w2, (0, 2, 1)).astype(compute_dtype)    # [7, Ch, Cin]
    b_comb = jnp.concatenate([b1, b2]).reshape(Cout, 1).astype(jnp.float32)
    g_eff = (g.reshape(Cout, 1) * (Cout ** 0.5)).astype(jnp.float32)

    # Native NCHW with flattened spatial — contiguous reshape, no transpose, no pad.
    x_flat = x_nchw.reshape(N, Cin, HW)

    has_ss = scale_shift is not None
    operands = [x_flat, w1_t, w2_t, b_comb, g_eff]
    in_specs = [
        pl.BlockSpec((None, Cin, HW), lambda n: (n, 0, 0)),
        pl.BlockSpec((3, Ch, Cin), lambda n: (0, 0, 0)),
        pl.BlockSpec((7, Ch, Cin), lambda n: (0, 0, 0)),
        pl.BlockSpec((Cout, 1), lambda n: (0, 0)),
        pl.BlockSpec((Cout, 1), lambda n: (0, 0)),
    ]
    if has_ss:
        s, sh = scale_shift
        operands.append(jnp.reshape(s, (N, Cout, 1)).astype(jnp.float32))
        operands.append(jnp.reshape(sh, (N, Cout, 1)).astype(jnp.float32))
        in_specs.append(pl.BlockSpec((None, Cout, 1), lambda n: (n, 0, 0)))
        in_specs.append(pl.BlockSpec((None, Cout, 1), lambda n: (n, 0, 0)))

    out_flat = pl.pallas_call(
        _make_block_kernel(W, has_ss, compute_dtype),
        out_shape=jax.ShapeDtypeStruct((N, Cout, HW), x_nchw.dtype),
        grid_spec=pltpu.PrefetchScalarGridSpec(
            num_scalar_prefetch=0,
            grid=(N,),                                   # one image per grid step
            in_specs=in_specs,
            out_specs=pl.BlockSpec((None, Cout, HW), lambda n: (n, 0, 0)),
        ),
        compiler_params=pltpu.CompilerParams(
            dimension_semantics=("parallel",),
            vmem_limit_bytes=_vmem_limit_bytes()),
    )(*operands)

    return out_flat.reshape(N, Cout, H, W)   # contiguous reshape, no data movement


def init_params(key, dim, dim_out):
    ch = dim_out // 2
    k1, k2, k3, k4 = jax.random.split(key, 4)
    # PyTorch Conv2d weights are [Cout, Cin, kh, kw]; stored here as [taps, Cin, Ch].
    fan1 = dim * 1 * 3
    fan2 = dim * 7 * 1
    bound1 = 1.0 / math.sqrt(fan1)
    bound2 = 1.0 / math.sqrt(fan2)
    w1 = jax.random.uniform(k1, (3, dim, ch), jnp.float32, -bound1, bound1)
    b1 = jax.random.uniform(k2, (ch,), jnp.float32, -bound1, bound1)
    w2 = jax.random.uniform(k3, (7, dim, ch), jnp.float32, -bound2, bound2)
    b2 = jax.random.uniform(k4, (ch,), jnp.float32, -bound2, bound2)
    g = jnp.ones((dim_out,), jnp.float32)   # RMSNorm gain (torch: (1, dim_out, 1, 1))
    return {"w1": w1, "b1": b1, "w2": w2, "b2": b2, "g": g}


def _reference(x_nchw, params, scale_shift=None, compute_dtype=jnp.float32):
    """Pure-JAX reference mirroring the PyTorch forward.  `compute_dtype` quantizes
    x and the conv weights the same way the kernel does (bf16-appropriate check)."""
    q = lambda a: a.astype(compute_dtype).astype(jnp.float32)
    w1, w2 = q(params["w1"]), q(params["w2"])
    b1 = params["b1"].astype(jnp.float32)
    b2 = params["b2"].astype(jnp.float32)
    g = params["g"].astype(jnp.float32)
    N, Cin, H, W = x_nchw.shape
    Cout = g.shape[0]
    x = jnp.transpose(q(x_nchw), (0, 2, 3, 1))                    # NHWC f32
    xp = jnp.pad(x, ((0, 0), (3, 3), (1, 1), (0, 0)))
    hp = jax.lax.Precision.HIGHEST
    x1 = sum(jnp.einsum("nhwc,co->nhwo", xp[:, 3:3 + H, k:k + W, :], w1[k],
                        precision=hp) for k in range(3)) + b1
    x2 = sum(jnp.einsum("nhwc,co->nhwo", xp[:, k:k + H, 1:1 + W, :], w2[k],
                        precision=hp) for k in range(7)) + b2
    y = jnp.concatenate([x1, x2], axis=-1)
    l2 = jnp.sqrt(jnp.sum(y * y, axis=-1, keepdims=True))
    y = y / jnp.maximum(l2, 1e-12) * g * (Cout ** 0.5)
    if scale_shift is not None:
        s, sh = scale_shift
        s = jnp.reshape(s, (N, 1, 1, Cout))
        sh = jnp.reshape(sh, (N, 1, 1, Cout))
        y = y * (s + 1.0) + sh
    y = y * jax.nn.sigmoid(y)
    return jnp.transpose(y, (0, 3, 1, 2))


if __name__ == "__main__":
    key = jax.random.PRNGKey(0)
    kx, kp, ks, ksh = jax.random.split(key, 4)

    N, dim, dim_out, H, W = 2, 4, 8, 16, 16
    x = jax.random.normal(kx, (N, dim, H, W), jnp.float32)
    params = init_params(kp, dim, dim_out)

    # Path 1: scale_shift = None (specialized kernel, no zero tensors DMA'd).
    out = jax.block_until_ready(block_forward(x, params, None))
    ref = _reference(x, params, None, compute_dtype=jnp.bfloat16)
    assert out.shape == (N, dim_out, H, W)
    assert bool(jnp.allclose(out, ref, atol=2e-2, rtol=2e-2)), \
        f"max abs err = {float(jnp.max(jnp.abs(out - ref)))}"

    # Path 2: with scale_shift (shapes [N, Cout, 1, 1] as in typical usage).
    scale = 0.1 * jax.random.normal(ks, (N, dim_out, 1, 1), jnp.float32)
    shift = 0.1 * jax.random.normal(ksh, (N, dim_out, 1, 1), jnp.float32)
    out2 = jax.block_until_ready(block_forward(x, params, (scale, shift)))
    ref2 = _reference(x, params, (scale, shift), compute_dtype=jnp.bfloat16)
    assert bool(jnp.allclose(out2, ref2, atol=2e-2, rtol=2e-2)), \
        f"max abs err = {float(jnp.max(jnp.abs(out2 - ref2)))}"

    print("KERNEL_OK")
</pallas_src>

<mosaic_0001>
module attributes {stable_mosaic.version = 11 : i64} {
  func.func @kernel(%arg0: i32, %arg1: memref<1x4x256xf32, #tpu.memory_space<vmem>>, %arg2: memref<3x4x4xbf16, #tpu.memory_space<vmem>>, %arg3: memref<7x4x4xbf16, #tpu.memory_space<vmem>>, %arg4: memref<8x1xf32, #tpu.memory_space<vmem>>, %arg5: memref<8x1xf32, #tpu.memory_space<vmem>>, %arg6: memref<1x8x256xf32, #tpu.memory_space<vmem>>) attributes {dimension_semantics = [#tpu.dimension_semantics<parallel>], iteration_bounds = array<i64: 2>, scalar_prefetch = 0 : i64, scratch_operands = 0 : i64, tpu.core_type = #tpu.core_type<tc>, window_params = [{transform_indices = @transform_0, window_bounds = array<i64: 1, 4, 256>}, {pipeline_mode = #tpu.pipeline_mode<synchronous>, transform_indices = @transform_1, window_bounds = array<i64: 3, 4, 4>}, {pipeline_mode = #tpu.pipeline_mode<synchronous>, transform_indices = @transform_2, window_bounds = array<i64: 7, 4, 4>}, {pipeline_mode = #tpu.pipeline_mode<synchronous>, transform_indices = @transform_3, window_bounds = array<i64: 8, 1>}, {pipeline_mode = #tpu.pipeline_mode<synchronous>, transform_indices = @transform_4, window_bounds = array<i64: 8, 1>}, {transform_indices = @transform_5, window_bounds = array<i64: 1, 8, 256>}]} {
    %c0 = arith.constant 0 : index
    %c0_0 = arith.constant 0 : index
    %c0_1 = arith.constant 0 : index
    %0 = vector.load %arg1[%c0, %c0_0, %c0_1] : memref<1x4x256xf32, #tpu.memory_space<vmem>>, vector<1x4x256xf32>
    %1 = vector.shape_cast %0 : vector<1x4x256xf32> to vector<4x256xf32>
    %2 = arith.truncf %1 : vector<4x256xf32> to vector<4x256xbf16>
    %cst = arith.constant 0.000000e+00 : bf16
    %3 = vector.broadcast %cst : bf16 to vector<4x1xbf16>
    %4 = tpu.iota {dimensions = array<i32: 1>} : vector<1x256xi32>
    %c16_i32 = arith.constant 16 : i32
    %c0_i32 = arith.constant 0 : i32
    %5 = arith.cmpi eq, %c16_i32, %c0_i32 : i32
    %c1_i32 = arith.constant 1 : i32
    %6 = arith.select %5, %c1_i32, %c16_i32 : i32
    %7 = vector.broadcast %6 : i32 to vector<1x256xi32>
    %8 = arith.remsi %4, %7 : vector<1x256xi32>
    %c0_i32_2 = arith.constant 0 : i32
    %9 = vector.broadcast %c0_i32_2 : i32 to vector<1x256xi32>
    %10 = arith.cmpi ne, %8, %9 : vector<1x256xi32>
    %c0_i32_3 = arith.constant 0 : i32
    %11 = vector.broadcast %c0_i32_3 : i32 to vector<1x256xi32>
    %12 = arith.cmpi slt, %8, %11 : vector<1x256xi32>
    %c0_i32_4 = arith.constant 0 : i32
    %13 = arith.cmpi slt, %6, %c0_i32_4 : i32
    %14 = vector.broadcast %13 : i1 to vector<1x256xi1>
    %15 = vector.broadcast %14 : vector<1x256xi1> to vector<1x256xi1>
    %16 = arith.xori %12, %15 : vector<1x256xi1>
    %17 = arith.andi %16, %10 : vector<1x256xi1>
    %18 = vector.broadcast %6 : i32 to vector<1x256xi32>
    %19 = arith.addi %8, %18 : vector<1x256xi32>
    %20 = arith.select %17, %19, %8 : vector<1x256xi1>, vector<1x256xi32>
    %c1 = arith.constant 1 : index
    %c0_5 = arith.constant 0 : index
    %c0_6 = arith.constant 0 : index
    %21 = vector.load %arg2[%c1, %c0_5, %c0_6] : memref<3x4x4xbf16, #tpu.memory_space<vmem>>, vector<1x4x4xbf16>
    %22 = vector.shape_cast %21 : vector<1x4x4xbf16> to vector<4x4xbf16>
    %cst_7 = arith.constant dense<0.000000e+00> : vector<4x256xf32>
    %23 = tpu.matmul %22, %2, %cst_7 {dimension_numbers = #tpu.dot_dimension_numbers<[1], [0], [0], [1], [0, 0, 1, 1], [], []>} : vector<4x4xbf16>, vector<4x256xbf16>, vector<4x256xf32> -> vector<4x256xf32>
    %24 = vector.extract_strided_slice %2 {offsets = [0, 0], sizes = [4, 255], strides = [1, 1]} : vector<4x256xbf16> to vector<4x255xbf16>
    %25 = tpu.concatenate %3, %24 in 1 : vector<4x1xbf16>, vector<4x255xbf16> -> vector<4x256xbf16>
    %c0_i32_8 = arith.constant 0 : i32
    %26 = vector.broadcast %c0_i32_8 : i32 to vector<1x256xi32>
    %27 = arith.cmpi ne, %20, %26 : vector<1x256xi32>
    %cst_9 = arith.constant 0.000000e+00 : bf16
    %28 = vector.broadcast %cst_9 : bf16 to vector<4x256xbf16>
    %29 = vector.shape_cast %27 : vector<1x256xi1> to vector<1x256xi1>
    %30 = vector.broadcast %29 : vector<1x256xi1> to vector<4x256xi1>
    %31 = arith.select %30, %25, %28 : vector<4x256xi1>, vector<4x256xbf16>
    %c0_10 = arith.constant 0 : index
    %c0_11 = arith.constant 0 : index
    %c0_12 = arith.constant 0 : index
    %32 = vector.load %arg2[%c0_10, %c0_11, %c0_12] : memref<3x4x4xbf16, #tpu.memory_space<vmem>>, vector<1x4x4xbf16>
    %33 = vector.shape_cast %32 : vector<1x4x4xbf16> to vector<4x4xbf16>
    %cst_13 = arith.constant dense<0.000000e+00> : vector<4x256xf32>
    %34 = tpu.matmul %33, %31, %cst_13 {dimension_numbers = #tpu.dot_dimension_numbers<[1], [0], [0], [1], [0, 0, 1, 1], [], []>} : vector<4x4xbf16>, vector<4x256xbf16>, vector<4x256xf32> -> vector<4x256xf32>
    %35 = arith.addf %23, %34 : vector<4x256xf32>
    %36 = vector.extract_strided_slice %2 {offsets = [0, 1], sizes = [4, 255], strides = [1, 1]} : vector<4x256xbf16> to vector<4x255xbf16>
    %37 = tpu.concatenate %36, %3 in 1 : vector<4x255xbf16>, vector<4x1xbf16> -> vector<4x256xbf16>
    %c15_i32 = arith.constant 15 : i32
    %38 = vector.broadcast %c15_i32 : i32 to vector<1x256xi32>
    %39 = arith.cmpi ne, %20, %38 : vector<1x256xi32>
    %cst_14 = arith.constant 0.000000e+00 : bf16
    %40 = vector.broadcast %cst_14 : bf16 to vector<4x256xbf16>
    %41 = vector.shape_cast %39 : vector<1x256xi1> to vector<1x256xi1>
    %42 = vector.broadcast %41 : vector<1x256xi1> to vector<4x256xi1>
    %43 = arith.select %42, %37, %40 : vector<4x256xi1>, vector<4x256xbf16>
    %c2 = arith.constant 2 : index
    %c0_15 = arith.constant 0 : index
    %c0_16 = arith.constant 0 : index
    %44 = vector.load %arg2[%c2, %c0_15, %c0_16] : memref<3x4x4xbf16, #tpu.memory_space<vmem>>, vector<1x4x4xbf16>
    %45 = vector.shape_cast %44 : vector<1x4x4xbf16> to vector<4x4xbf16>
    %cst_17 = arith.constant dense<0.000000e+00> : vector<4x256xf32>
    %46 = tpu.matmul %45, %43, %cst_17 {dimension_numbers = #tpu.dot_dimension_numbers<[1], [0], [0], [1], [0, 0, 1, 1], [], []>} : vector<4x4xbf16>, vector<4x256xbf16>, vector<4x256xf32> -> vector<4x256xf32>
    %47 = arith.addf %35, %46 : vector<4x256xf32>
    %c3 = arith.constant 3 : index
    %c0_18 = arith.constant 0 : index
    %c0_19 = arith.constant 0 : index
    %48 = vector.load %arg3[%c3, %c0_18, %c0_19] : memref<7x4x4xbf16, #tpu.memory_space<vmem>>, vector<1x4x4xbf16>
    %49 = vector.shape_cast %48 : vector<1x4x4xbf16> to vector<4x4xbf16>
    %cst_20 = arith.constant dense<0.000000e+00> : vector<4x256xf32>
    %50 = tpu.matmul %49, %2, %cst_20 {dimension_numbers = #tpu.dot_dimension_numbers<[1], [0], [0], [1], [0, 0, 1, 1], [], []>} : vector<4x4xbf16>, vector<4x256xbf16>, vector<4x256xf32> -> vector<4x256xf32>
    %cst_21 = arith.constant 0.000000e+00 : bf16
    %51 = vector.broadcast %cst_21 : bf16 to vector<4x48xbf16>
    %52 = vector.extract_strided_slice %2 {offsets = [0, 0], sizes = [4, 208], strides = [1, 1]} : vector<4x256xbf16> to vector<4x208xbf16>
    %53 = tpu.concatenate %51, %52 in 1 : vector<4x48xbf16>, vector<4x208xbf16> -> vector<4x256xbf16>
    %c0_22 = arith.constant 0 : index
    %c0_23 = arith.constant 0 : index
    %c0_24 = arith.constant 0 : index
    %54 = vector.load %arg3[%c0_22, %c0_23, %c0_24] : memref<7x4x4xbf16, #tpu.memory_space<vmem>>, vector<1x4x4xbf16>
    %55 = vector.shape_cast %54 : vector<1x4x4xbf16> to vector<4x4xbf16>
    %cst_25 = arith.constant dense<0.000000e+00> : vector<4x256xf32>
    %56 = tpu.matmul %55, %53, %cst_25 {dimension_numbers = #tpu.dot_dimension_numbers<[1], [0], [0], [1], [0, 0, 1, 1], [], []>} : vector<4x4xbf16>, vector<4x256xbf16>, vector<4x256xf32> -> vector<4x256xf32>
    %57 = arith.addf %50, %56 : vector<4x256xf32>
    %cst_26 = arith.constant 0.000000e+00 : bf16
    %58 = vector.broadcast %cst_26 : bf16 to vector<4x32xbf16>
    %59 = vector.extract_strided_slice %2 {offsets = [0, 0], sizes = [4, 224], strides = [1, 1]} : vector<4x256xbf16> to vector<4x224xbf16>
    %60 = tpu.concatenate %58, %59 in 1 : vector<4x32xbf16>, vector<4x224xbf16> -> vector<4x256xbf16>
    %c1_27 = arith.constant 1 : index
    %c0_28 = arith.constant 0 : index
    %c0_29 = arith.constant 0 : index
    %61 = vector.load %arg3[%c1_27, %c0_28, %c0_29] : memref<7x4x4xbf16, #tpu.memory_space<vmem>>, vector<1x4x4xbf16>
    %62 = vector.shape_cast %61 : vector<1x4x4xbf16> to vector<4x4xbf16>
    %cst_30 = arith.constant dense<0.000000e+00> : vector<4x256xf32>
    %63 = tpu.matmul %62, %60, %cst_30 {dimension_numbers = #tpu.dot_dimension_numbers<[1], [0], [0], [1], [0, 0, 1, 1], [], []>} : vector<4x4xbf16>, vector<4x256xbf16>, vector<4x256xf32> -> vector<4x256xf32>
    %64 = arith.addf %57, %63 : vector<4x256xf32>
    %cst_31 = arith.constant 0.000000e+00 : bf16
    %65 = vector.broadcast %cst_31 : bf16 to vector<4x16xbf16>
    %66 = vector.extract_strided_slice %2 {offsets = [0, 0], sizes = [4, 240], strides = [1, 1]} : vector<4x256xbf16> to vector<4x240xbf16>
    %67 = tpu.concatenate %65, %66 in 1 : vector<4x16xbf16>, vector<4x240xbf16> -> vector<4x256xbf16>
    %c2_32 = arith.constant 2 : index
    %c0_33 = arith.constant 0 : index
    %c0_34 = arith.constant 0 : index
    %68 = vector.load %arg3[%c2_32, %c0_33, %c0_34] : memref<7x4x4xbf16, #tpu.memory_space<vmem>>, vector<1x4x4xbf16>
    %69 = vector.shape_cast %68 : vector<1x4x4xbf16> to vector<4x4xbf16>
    %cst_35 = arith.constant dense<0.000000e+00> : vector<4x256xf32>
    %70 = tpu.matmul %69, %67, %cst_35 {dimension_numbers = #tpu.dot_dimension_numbers<[1], [0], [0], [1], [0, 0, 1, 1], [], []>} : vector<4x4xbf16>, vector<4x256xbf16>, vector<4x256xf32> -> vector<4x256xf32>
    %71 = arith.addf %64, %70 : vector<4x256xf32>
    %72 = vector.extract_strided_slice %2 {offsets = [0, 16], sizes = [4, 240], strides = [1, 1]} : vector<4x256xbf16> to vector<4x240xbf16>
    %cst_36 = arith.constant 0.000000e+00 : bf16
    %73 = vector.broadcast %cst_36 : bf16 to vector<4x16xbf16>
    %74 = tpu.concatenate %72, %73 in 1 : vector<4x240xbf16>, vector<4x16xbf16> -> vector<4x256xbf16>
    %c4 = arith.constant 4 : index
    %c0_37 = arith.constant 0 : index
    %c0_38 = arith.constant 0 : index
    %75 = vector.load %arg3[%c4, %c0_37, %c0_38] : memref<7x4x4xbf16, #tpu.memory_space<vmem>>, vector<1x4x4xbf16>
    %76 = vector.shape_cast %75 : vector<1x4x4xbf16> to vector<4x4xbf16>
    %cst_39 = arith.constant dense<0.000000e+00> : vector<4x256xf32>
    %77 = tpu.matmul %76, %74, %cst_39 {dimension_numbers = #tpu.dot_dimension_numbers<[1], [0], [0], [1], [0, 0, 1, 1], [], []>} : vector<4x4xbf16>, vector<4x256xbf16>, vector<4x256xf32> -> vector<4x256xf32>
    %78 = arith.addf %71, %77 : vector<4x256xf32>
    %79 = vector.extract_strided_slice %2 {offsets = [0, 32], sizes = [4, 224], strides = [1, 1]} : vector<4x256xbf16> to vector<4x224xbf16>
    %cst_40 = arith.constant 0.000000e+00 : bf16
    %80 = vector.broadcast %cst_40 : bf16 to vector<4x32xbf16>
    %81 = tpu.concatenate %79, %80 in 1 : vector<4x224xbf16>, vector<4x32xbf16> -> vector<4x256xbf16>
    %c5 = arith.constant 5 : index
    %c0_41 = arith.constant 0 : index
    %c0_42 = arith.constant 0 : index
    %82 = vector.load %arg3[%c5, %c0_41, %c0_42] : memref<7x4x4xbf16, #tpu.memory_space<vmem>>, vector<1x4x4xbf16>
    %83 = vector.shape_cast %82 : vector<1x4x4xbf16> to vector<4x4xbf16>
    %cst_43 = arith.constant dense<0.000000e+00> : vector<4x256xf32>
    %84 = tpu.matmul %83, %81, %cst_43 {dimension_numbers = #tpu.dot_dimension_numbers<[1], [0], [0], [1], [0, 0, 1, 1], [], []>} : vector<4x4xbf16>, vector<4x256xbf16>, vector<4x256xf32> -> vector<4x256xf32>
    %85 = arith.addf %78, %84 : vector<4x256xf32>
    %86 = vector.extract_strided_slice %2 {offsets = [0, 48], sizes = [4, 208], strides = [1, 1]} : vector<4x256xbf16> to vector<4x208xbf16>
    %cst_44 = arith.constant 0.000000e+00 : bf16
    %87 = vector.broadcast %cst_44 : bf16 to vector<4x48xbf16>
    %88 = tpu.concatenate %86, %87 in 1 : vector<4x208xbf16>, vector<4x48xbf16> -> vector<4x256xbf16>
    %c6 = arith.constant 6 : index
    %c0_45 = arith.constant 0 : index
    %c0_46 = arith.constant 0 : index
    %89 = vector.load %arg3[%c6, %c0_45, %c0_46] : memref<7x4x4xbf16, #tpu.memory_space<vmem>>, vector<1x4x4xbf16>
    %90 = vector.shape_cast %89 : vector<1x4x4xbf16> to vector<4x4xbf16>
    %cst_47 = arith.constant dense<0.000000e+00> : vector<4x256xf32>
    %91 = tpu.matmul %90, %88, %cst_47 {dimension_numbers = #tpu.dot_dimension_numbers<[1], [0], [0], [1], [0, 0, 1, 1], [], []>} : vector<4x4xbf16>, vector<4x256xbf16>, vector<4x256xf32> -> vector<4x256xf32>
    %92 = arith.addf %85, %91 : vector<4x256xf32>
    %93 = tpu.concatenate %47, %92 in 0 : vector<4x256xf32>, vector<4x256xf32> -> vector<8x256xf32>
    %c0_48 = arith.constant 0 : index
    %c0_49 = arith.constant 0 : index
    %94 = vector.load %arg4[%c0_48, %c0_49] : memref<8x1xf32, #tpu.memory_space<vmem>>, vector<8x1xf32>
    %95 = vector.broadcast %94 : vector<8x1xf32> to vector<8x256xf32>
    %96 = arith.addf %93, %95 : vector<8x256xf32>
    %cst_50 = arith.constant 1.000000e+00 : f32
    %97 = vector.broadcast %cst_50 : f32 to vector<1x8xf32>
    %98 = arith.mulf %96, %96 : vector<8x256xf32>
    %cst_51 = arith.constant dense<0.000000e+00> : vector<1x256xf32>
    %99 = tpu.matmul %97, %98, %cst_51 {dimension_numbers = #tpu.dot_dimension_numbers<[1], [0], [0], [1], [0, 0, 1, 1], [], []>} : vector<1x8xf32>, vector<8x256xf32>, vector<1x256xf32> -> vector<1x256xf32>
    %cst_52 = arith.constant 1.000000e-24 : f32
    %100 = vector.broadcast %cst_52 : f32 to vector<1x256xf32>
    %101 = arith.maximumf %99, %100 : vector<1x256xf32>
    %102 = math.rsqrt %101 : vector<1x256xf32>
    %103 = vector.broadcast %102 : vector<1x256xf32> to vector<8x256xf32>
    %104 = arith.mulf %96, %103 : vector<8x256xf32>
    %c0_53 = arith.constant 0 : index
    %c0_54 = arith.constant 0 : index
    %105 = vector.load %arg5[%c0_53, %c0_54] : memref<8x1xf32, #tpu.memory_space<vmem>>, vector<8x1xf32>
    %106 = vector.broadcast %105 : vector<8x1xf32> to vector<8x256xf32>
    %107 = arith.mulf %104, %106 : vector<8x256xf32>
    %108 = arith.negf %107 : vector<8x256xf32>
    %109 = math.exp %108 : vector<8x256xf32>
    %cst_55 = arith.constant 1.000000e+00 : f32
    %110 = vector.broadcast %cst_55 : f32 to vector<8x256xf32>
    %111 = arith.addf %110, %109 : vector<8x256xf32>
    %112 = arith.divf %110, %111 : vector<8x256xf32>
    %113 = arith.mulf %107, %112 : vector<8x256xf32>
    %c0_56 = arith.constant 0 : index
    %c0_57 = arith.constant 0 : index
    %c0_58 = arith.constant 0 : index
    %114 = vector.load %arg6[%c0_56, %c0_57, %c0_58] : memref<1x8x256xf32, #tpu.memory_space<vmem>>, vector<1x8x256xf32>
    %115 = vector.shape_cast %114 : vector<1x8x256xf32> to vector<8x256xf32>
    %116 = vector.shape_cast %113 : vector<8x256xf32> to vector<1x8x256xf32>
    tpu.vector_store %arg6[%c0_56, %c0_57, %c0_58], %116 {strides = array<i32>} : memref<1x8x256xf32, #tpu.memory_space<vmem>>, vector<1x8x256xf32>,
    return
  }
  func.func @transform_0(%arg0: i32) -> (i32, i32, i32) {
    %c0_i32 = arith.constant 0 : i32
    %c0_i32_0 = arith.constant 0 : i32
    %c0_i32_1 = arith.constant 0 : i32
    return %arg0, %c0_i32, %c0_i32_0 : i32, i32, i32
  }
  func.func @transform_1(%arg0: i32) -> (i32, i32, i32) {
    %c0_i32 = arith.constant 0 : i32
    %c0_i32_0 = arith.constant 0 : i32
    %c0_i32_1 = arith.constant 0 : i32
    %c0_i32_2 = arith.constant 0 : i32
    return %c0_i32, %c0_i32_0, %c0_i32_1 : i32, i32, i32
  }
  func.func @transform_2(%arg0: i32) -> (i32, i32, i32) {
    %c0_i32 = arith.constant 0 : i32
    %c0_i32_0 = arith.constant 0 : i32
    %c0_i32_1 = arith.constant 0 : i32
    %c0_i32_2 = arith.constant 0 : i32
    return %c0_i32, %c0_i32_0, %c0_i32_1 : i32, i32, i32
  }
  func.func @transform_3(%arg0: i32) -> (i32, i32) {
    %c0_i32 = arith.constant 0 : i32
    %c0_i32_0 = arith.constant 0 : i32
    %c0_i32_1 = arith.constant 0 : i32
    return %c0_i32, %c0_i32_0 : i32, i32
  }
  func.func @transform_4(%arg0: i32) -> (i32, i32) {
    %c0_i32 = arith.constant 0 : i32
    %c0_i32_0 = arith.constant 0 : i32
    %c0_i32_1 = arith.constant 0 : i32
    return %c0_i32, %c0_i32_0 : i32, i32
  }
  func.func @transform_5(%arg0: i32) -> (i32, i32, i32) {
    %c0_i32 = arith.constant 0 : i32
    %c0_i32_0 = arith.constant 0 : i32
    %c0_i32_1 = arith.constant 0 : i32
    return %arg0, %c0_i32, %c0_i32_0 : i32, i32, i32
  }
}

</mosaic_0001>

<bundles_post_ra>
// kernel: tpu_custom_call.1
= control target key start
LH: loop header
LB: loop body
LE: loop exit
PB: predicated region body
PF: predicated region fallthrough
CT: control target
= control target key end

     0   :  { %10 = vsyncpa [#allocation3], 0  ;;  %s1592_s0 = inlined_call_operand.vmem [shape: f32[2,4,256], index: 0, kind: input, shape index: {}]   ;;  %s1593_s1 = inlined_call_operand.vmem [shape: bf16[3,4,4], index: 1, kind: input, shape index: {}]   ;;  %s1594_s2 = inlined_call_operand.vmem [shape: bf16[7,4,4], index: 2, kind: input, shape index: {}]   ;;  %s1595_s3 = inlined_call_operand.vmem [shape: f32[8,1], index: 3, kind: input, shape index: {}]   ;;  %s1596_s4 = inlined_call_operand.vmem [shape: f32[8,1], index: 4, kind: input, shape index: {}]   ;;  %s1597_s5 = inlined_call_operand.hbm [shape: f32[2,8,256], index: 5, kind: output, shape index: {}]  }
   0x1   :  { %12 = vsyncpa [#allocation3 + $0x1], 0  ;;  %s1350_s18 = smov 0   ;;  %s1352_s19 = smov 0  }
   0x2   :  { %s1354_s20 = smov 0   ;;  %s1356_s21 = smov 0  }
   0x3 LB: > { %s1371_s22 = sadd.s32 4294967295, %s1306_s21   ;;  %s1104_s23 = sadd.s32 4294967294, %s1306_s21   ;;  %s1306_s21 = sphi %s1356_s21, %s1611_s21   ;;  %s1302_s20 = sphi %s1354_s20, %s1610_s20   ;;  %s1298_s19 = sphi %s1352_s19, %s1609_s19   ;;  %s1294_s18 = sphi %s1350_s18, %s1608_s18  }
   0x4   : > { %s1375_s24 = sadd.s32 1, %s1306_s21   ;;  %s135_s25 = sadd.s32 1, %s1302_s20 }
   0x5   : > { %s132_s26 = ssub.s32 %s1306_s21, %s1375_s24  ;;  %p145_p0 = scmp.ne.s32.totalorder %s1302_s20, %s1298_s19 }
   0x6   : > { %p133_p1 = scmp.eq.s32.totalorder %s132_s26, 0  ;;  %p146_p2 = scmp.eq.s32.totalorder %s1371_s22, 1 }
   0x7   : > { %p151_p3 = scmp.ne.s32.totalorder %s1298_s19, %s1294_s18  ;;  %p152_p4 = scmp.eq.s32.totalorder %s1104_s23, 1 }
   0x8   : > { %s1386_s27 = scalar_select %p133_p1, %s1302_s20, %s135_s25  }
   0x9   : > { %p1388_p5 = por %p146_p2, %p145_p0  ;;  %p1392_p6 = por %p152_p4, %p151_p3 }
   0xa   : > { %p1107_p7 = scmp.ge.s32.totalorder %s1306_s21, 1  ;;  %p190_p8 = scmp.lt.s32.totalorder %s1306_s21, 3 }
   0xc   : > { %p191_p9 = pnand %p1107_p7, %p190_p8 }
   0xd   : > { %p218_p10 = scmp.lt.s32.totalorder (!%p191_p9), %s1371_s22, 1  ;;  %v1308_v0 = vmov (!%p191_p9), 0   ;;  %s1309_s10 = smov (!%p191_p9), 1   ;;  %v907_v5 = vld [vmem:[%s1595_s3] sm:$0xff] (!%p191_p9)  ;;  %v232_v6 = vlaneseq (!%p191_p9)  ;;  %vm267_vm3 = vcmask (!%p191_p9), 7168   ;;  %vm592_vm5 = vcmask (!%p191_p9), 261120  }
   0xe   : > { %194 = sbr.rel (%p191_p9) target bundleno = 698 (0x2ba), region = 40  ;;  %639 = vmatprep.mubr.bf16.mxu1 (!%p191_p9), %v1308_v0  ;;  %339 = vmatprep.mubr.bf16.mxu0 (!%p191_p9), %v1308_v0  ;;  %s1310_s11 = smov (!%p191_p9), 32   ;;  %vm300_vm8 = vcmask (!%p191_p9), 1041408   ;;  %vm654_vm11 = vcmask (!%p191_p9), 130048   ;;  %vm296_vm12 = vcmask (!%p191_p9), 31744   ;;  %vm716_vm13 = vcmask (!%p191_p9), 916480  }
   0xf   : > { %1229 = vset.pattern.permute.xlu0 (!%p191_p9), %v1308_v0  ;;  %1230 = vset.pattern.permute.xlu1 (!%p191_p9), %v1308_v0  ;;  %s1311_s12 = smov (!%p191_p9), 16   ;;  %s1312_s13 = smov (!%p191_p9), 112   ;;  %v233_v7 = vand.u32 (!%p191_p9), 127, %v232_v6  ;;  %v284_v11 = vshrl.u32 (!%p191_p9), %v232_v6, 7  ;;  %v1124_v32 = vld [vmem:[%s1594_s2 + $0x2] sm:$0x3] (!%p191_p9) }
  0x10   : > { %s1313_s14 = smov (!%p191_p9), 127   ;;  %s1314_s15 = smov (!%p191_p9), 48   ;;  %v295_v33 = vld [vmem:[%s1593_s1] sm:$0x3] (!%p191_p9)  ;;  %vm402_vm14 = vcmask (!%p191_p9), 1039360   ;;  %v1317_v17 = vmov (!%p191_p9), 0.0  }
  0x11   : > { %s1315_s16 = smov (!%p191_p9), 96   ;;  %s1316_s17 = smov (!%p191_p9), 80   ;;  %v234_v8 = vadd.s32 (!%p191_p9), 128, %v233_v7  ;;  %v239_v9 = vand.u32 (!%p191_p9), 15, %v233_v7  ;;  %v1430_v12 = vsub.s32 (!%p191_p9), 0, %v284_v11  ;;  %v289_v14 = vsub.s32 (!%p191_p9), 4, %v284_v11 }
  0x12   : > { %v1127_v54 = vld [vmem:[%s1594_s2 + $0x4] sm:$0x3] (!%p191_p9)  ;;  %v1111_v55 = vld [vmem:[%s1593_s1 + $0x2] sm:$0x3] (!%p191_p9)  ;;  %v494_v11 = vld [vmem:[%s1594_s2] sm:$0x3] (!%p191_p9) }
  0x13   : > { %v246_v10 = vand.u32 (!%p191_p9), 15, %v234_v8  ;;  %vm275_vm0 = vcmp.ne.s32.totalorder (!%p191_p9), %v239_v9, 0  ;;  %vm1441_vm6 = vcmp.ne.s32.totalorder (!%p191_p9), %v239_v9, 15  ;;  %s1319_s25 = smov (!%p191_p9), [#allocation2]  }
  0x14   : > { %s1248_s26 = sshll.u32 (!%p191_p9), %s1319_s25, 4  ;;  %s1249_s26 = int_to_ptr.vmem [resolvable:$false] %s1248_s26 }
  0x15   : > { %s219_s30 = scalar_select %p218_p10, %s1371_s22, 1  ;;  %vm276_vm1 = vcmp.ne.s32.totalorder %v246_v10, 0  ;;  %vm1445_vm7 = vcmp.ne.s32.totalorder %v246_v10, 15 }
  0x16   : > { %vm281_vm2 = vmpackc.low %vm276_vm1, %vm275_vm0  ;;  %vm489_vm1 = vcmask 392192  }
  0x17   : > { %s1147_s6 = sshll.u32 %s219_s30, 3  ;;  %v282_v13 = vsel %vm281_vm2, 65537, %v1308_v0  ;;  %vm415_vm10 = vmpackc.low %vm1445_vm7, %vm1441_vm6  ;;  %vm778_vm2 = vcmask 785408   ;;  %s1250_s30 = scalar_lea.vmem %s1249_s26, 512 }
  0x18   : > { %s222_s9 = scalar_lea.vmem %s1592_s0, %s1147_s6  ;;  %v286_v15 = vrot.slane %v282_v13, %v1430_v12  ;;  %v290_v16 = vrot.slane %v282_v13, %v289_v14  ;;  %v416_v36 = vsel %vm415_vm10, 65537, %v1308_v0 }
  0x19   : > { %v226_v1 = vld [vmem:[%s222_s9] sm:$0xff]  ;;  %v424_v41 = vrot.slane %v416_v36, %v289_v14  ;;  %v420_v42 = vrot.slane %v416_v36, %v1430_v12  ;;  %v1133_v14 = vld [vmem:[%s1594_s2 + $0xa] sm:$0x3] }
  0x1a   : > { %v1407_v2 = vpack.c.bf16 %v226_v1, %v226_v1  ;;  %v228_v3 = vcombine.high %v226_v1, %v226_v1  ;;  %vm1434_vm4 = vcmp.ne.s16.totalorder %v286_v15, 0  ;;  %vm292_vm9 = vcmp.ne.s16.totalorder %v290_v16, 0  ;;  %v1136_v16 = vld [vmem:[%s1594_s2 + $0xc] sm:$0x3] }
  0x1b   : > { %vm426_vm15 = vcmp.ne.s16.totalorder %v424_v41, 0  ;;  %vm1481_vm0 = vcmp.ne.s16.totalorder %v420_v42, 0  ;;  %v1318_v41 = vmov 1.0  }
  0x1c   : > { %263 = vrot.lane.b32.xlu1 %v1407_v2, %s1309_s10  ;;  %v1410_v4 = vpack.c.bf16 %v228_v3, %v228_v3  ;;  %588 = vrot.lane.b32.xlu0 %v1407_v2, %s1310_s11  ;;  %v1469_v39 = vsel %vm300_vm8, %v1407_v2, 0  ;;  %v1130_v3 = vld [vmem:[%s1594_s2 + $0x8] sm:$0x3] }
  0x20   : > { %265 = vrot.lane.b32.xlu1 %v1410_v4, %s1309_s10  ;;  %590 = vrot.lane.b32.xlu0 %v1410_v4, %s1310_s11  ;;  %s215_s10 = sand.u32 1, %s1298_s19  }
  0x21   : > { %s1108_s11 = sshll.u32 %s215_s10, 4  ;;  %s1031_s23 = scalar_lea.sflag [#allocation3], %s215_s10 }
  0x24   : > { %652 = vrot.lane.b32.xlu1 %v1410_v4, %s1311_s12  ;;  %650 = vrot.lane.b32.xlu0 %v1407_v2, %s1311_s12  ;;  %s1148_s12 = sshll.u32 %s1371_s22, 8 }
  0x28   : > { %714 = vrot.lane.b32.xlu1 %v1410_v4, %s1312_s13  ;;  %712 = vrot.lane.b32.xlu0 %v1407_v2, %s1312_s13  ;;  %s217_s13 = scalar_lea.vmem [#allocation2], %s1108_s11 }
  0x2c   : > { %400 = vrot.lane.b32.xlu1 %v1410_v4, %s1313_s14  ;;  %398 = vrot.lane.b32.xlu0 %v1407_v2, %s1313_s14  ;;  %s1045_s14 = sshll.u32 %s217_s13, 4  ;;  %s1552_s14 = int_to_ptr.vmem [resolvable:$true] %s1045_s14 }
  0x2d   : > { %s1244_s22 = scalar_lea.vmem %s1552_s14, 256  ;;  %p1251_p0 = scmp.lt.s32.totalorder %s1552_s14, %s1249_s26 }
  0x2e   : > { %p1245_p11 = scmp.ne.s32.totalorder %s1552_s14, %s1244_s22  ;;  %p1252_p1 = scmp.lt.s32.totalorder %s1250_s30, %s1244_s22 }
  0x30   : > { %487 = vrot.lane.b32.xlu1 %v1410_v4, %s1314_s15  ;;  %485 = vrot.lane.b32.xlu0 %v1407_v2, %s1314_s15  ;;  %p1246_p12 = pnand %p1245_p11, %p1388_p5  ;;  %p1253_p2 = por %p1252_p1, %p1251_p0 }
  0x32   : > { %p1247_p13 = pneg %p1246_p12 }
  0x34   : > { %776 = vrot.lane.b32.xlu1 %v1410_v4, %s1315_s16  ;;  %774 = vrot.lane.b32.xlu0 %v1407_v2, %s1315_s16  ;;  %p1254_p3 = pnand %p1253_p2, %p1247_p13 }
  0x38   : > { %838 = vrot.lane.b32.xlu1 %v1410_v4, %s1316_s17  ;;  %836 = vrot.lane.b32.xlu0 %v1407_v2, %s1316_s17  ;;  %s1550_s17 = scalar_lea.hbm %s1597_s5, %s1148_s12 }
  0x3c   : > { %910 = vperm.xlu0 %1229, %v907_v5   ;;  %v1116_v5 = vld [vmem:[%s1593_s1 + $0x4] sm:$0x3] }
  0x8e   : > { %v264_v18 = vpop.permute.xlu1 %263  ;;  %v589_v19 = vpop.permute.xlu0 %588 }
  0x8f   : > { %v273_v20 = vsel %vm267_vm3, 0, %v264_v18  ;;  %v596_v24 = vsel %vm592_vm5, 0, %v589_v19 }
  0x90   : > { %v293_v21 = vsel %vm1434_vm4, %v273_v20, 0  ;;  %v602_v31 = vsel %vm300_vm8, %v596_v24, 0  ;;  %vm904_vm4 = vcmask 1043456  }
  0x91   : > { %v302_v29 = vsel %vm300_vm8, %v293_v21, 0 }
  0x92   : > { %v266_v25 = vpop.permute.xlu1 %265  ;;  %v591_v26 = vpop.permute.xlu0 %590 }
  0x93   : > { %v593_v27 = vsel %vm592_vm5, %v589_v19, %v591_v26  ;;  %v268_v28 = vsel %vm267_vm3, %v264_v18, %v266_v25  ;;  %vm840_vm3 = vcmask 654336   ;;  %v1006_v18 = vld [vmem:[%s1596_s4] sm:$0xff]  ;;  %vm917_vm5 = vcmask 64512  }
  0x94   : > { %1125 = vmatprep.subr.msk.bf16.mxu1 %vm300_vm8, %v593_v27  ;;  %v294_v30 = vsel %vm292_vm9, %v268_v28, 0  ;;  %1009 = vperm.xlu1 %1230, %v1006_v18  }
  0x95   : > { %1112 = vmatprep.subr.msk.bf16.mxu0 %vm300_vm8, %v294_v30  ;;  %608 = vmatpush1.bf16.msra.mxu1 %v602_v31 }
  0x96   : > { %308 = vmatpush1.bf16.msra.mxu0 %v302_v29  ;;  %v653_v34 = vpop.permute.xlu1 %652  ;;  %v651_v35 = vpop.permute.xlu0 %650 }
  0x97   : > { %v655_v37 = vsel %vm654_vm11, %v651_v35, %v653_v34  ;;  %v658_v38 = vsel %vm654_vm11, 0, %v651_v35  ;;  %1114 = vmatprep.subr.msk.bf16.mxu0 %vm300_vm8, %v1410_v4 }
  0x98   : > { %1126 = vmatmul.mubr.msk.bf16.vlgmr.msra.gmra.mrb[0].mxu1 %vm296_vm12, %v1124_v32  ;;  %v664_v40 = vsel %vm300_vm8, %v658_v38, 0  ;;  %1128 = vmatprep.subr.msk.bf16.mxu1 %vm300_vm8, %v655_v37 }
  0x99   : > { %1113 = vmatmul.mubr.msk.bf16.vlgmr.msra.gmra.mrb[0].mxu0 %vm296_vm12, %v295_v33  ;;  %670 = vmatpush1.bf16.msra.mxu1 %v664_v40 }
  0x9a   : > { %358 = vmatpush1.bf16.msra.mxu0 %v1469_v39  ;;  %701 = vmatprep.mubr.bf16.mxu1 %v1308_v0  ;;  %v715_v43 = vpop.permute.xlu1 %714  ;;  %v713_v44 = vpop.permute.xlu0 %712 }
  0x9b   : > { %389 = vmatprep.mubr.bf16.mxu0 %v1308_v0  ;;  %v720_v45 = vsel %vm716_vm13, %v715_v43, 0  ;;  %v717_v49 = vsel %vm716_vm13, %v713_v44, %v715_v43 }
  0x9c   : > { %1131 = vmatprep.subr.msk.bf16.mxu1 %vm300_vm8, %v720_v45  ;;  %v727_v56 = vsel %vm300_vm8, %v717_v49, 0 }
  0x9e   : > { %v401_v47 = vpop.permute.xlu1 %400  ;;  %v399_v48 = vpop.permute.xlu0 %398 }
  0x9f   : > { %v407_v50 = vsel %vm402_vm14, %v401_v47, 0  ;;  %v403_v51 = vsel %vm402_vm14, %v399_v48, %v401_v47 }
  0xa0   : > { %v428_v52 = vsel %vm426_vm15, %v407_v50, 0  ;;  %v427_v53 = vsel %vm1481_vm0, %v403_v51, 0 }
  0xa1   : > { %1117 = vmatprep.subr.msk.bf16.mxu0 %vm300_vm8, %v428_v52  ;;  %v435_v59 = vsel %vm300_vm8, %v427_v53, 0 }
  0xa2   : > { %v488_v57 = vpop.permute.xlu1 %487  ;;  %v486_v58 = vpop.permute.xlu0 %485 }
  0xa3   : > { %v490_v60 = vsel %vm489_vm1, %v486_v58, %v488_v57  ;;  %v493_v2 = vsel %vm489_vm1, 0, %v486_v58 }
  0xa4   : > { %1129 = vmatmul.mubr.msk.bf16.vlgmr.msra.gmra.mrb[0].mxu1 %vm296_vm12, %v1127_v54  ;;  %v498_v8 = vsel %vm300_vm8, %v493_v2, 0 }
  0xa5   : > { %1115 = vmatmul.mubr.msk.bf16.vlgmr.msra.gmra.mrb[0].mxu0 %vm296_vm12, %v1111_v55  ;;  %732 = vmatpush1.bf16.msra.mxu1 %v727_v56 }
  0xa6   : > { %441 = vmatpush1.bf16.msra.mxu0 %v435_v59  ;;  %763 = vmatprep.mubr.bf16.mxu1 %v1308_v0  ;;  %v777_v61 = vpop.permute.xlu1 %776  ;;  %v775_v63 = vpop.permute.xlu0 %774 }
  0xa7   : > { %472 = vmatprep.mubr.bf16.mxu0 %v1308_v0  ;;  %1120 = vmatprep.subr.msk.bf16.mxu0 %vm300_vm8, %v490_v60  ;;  %v782_v62 = vsel %vm778_vm2, %v777_v61, 0  ;;  %v779_v1 = vsel %vm778_vm2, %v775_v63, %v777_v61 }
  0xa8   : > { %1134 = vmatprep.subr.msk.bf16.mxu1 %vm300_vm8, %v782_v62  ;;  %v789_v6 = vsel %vm300_vm8, %v779_v1, 0 }
  0xaa   : > { %v839_v7 = vpop.permute.xlu1 %838  ;;  %v837_v10 = vpop.permute.xlu0 %836 }
  0xab   : > { %v844_v9 = vsel %vm840_vm3, %v839_v7, 0  ;;  %v841_v13 = vsel %vm840_vm3, %v837_v10, %v839_v7 }
  0xac   : > { %v851_v15 = vsel %vm300_vm8, %v841_v13, 0 }
  0xb0   : > { %1132 = vmatmul.mubr.msk.bf16.vlgmr.msra.gmra.mrb[0].mxu1 %vm296_vm12, %v1130_v3 }
  0xb1   : > { %1118 = vmatmul.mubr.msk.bf16.vlgmr.msra.gmra.mrb[0].mxu0 %vm296_vm12, %v1116_v5  ;;  %794 = vmatpush1.bf16.msra.mxu1 %v789_v6 }
  0xb2   : > { %504 = vmatpush1.bf16.msra.mxu0 %v498_v8  ;;  %535 = vmatprep.mubr.bf16.mxu0 %v1308_v0 }
  0xb3   : > { %825 = vmatprep.mubr.bf16.mxu1 %v1308_v0  ;;  %1122 = vmatprep.subr.msk.bf16.mxu0 %vm300_vm8, %v1410_v4  ;;  %v1119_v4 = vld [vmem:[%s1594_s2 + $0x6] sm:$0x3] }
  0xb4   : > { %1137 = vmatprep.subr.msk.bf16.mxu1 %vm300_vm8, %v844_v9 }
  0xb9   : > { %1121 = vmatmul.mubr.msk.bf16.vlgmr.msra.gmra.mrb[4].mxu0 %vm296_vm12, %v494_v11 }
  0xba   : > { %548 = vmatpush1.bf16.msra.mxu0 %v1469_v39  ;;  %579 = vmatprep.mubr.bf16.mxu0 %v1308_v0 }
  0xbb   : > { %v911_v33 = vpop.permute.xlu0 %910 }
  0xbc   : > { %1135 = vmatmul.mubr.msk.bf16.vlgmr.msra.gmra.mrb[0].mxu1 %vm296_vm12, %v1133_v14 }
  0xbd   : > { %856 = vmatpush1.bf16.msra.mxu1 %v851_v15  ;;  %887 = vmatprep.mubr.bf16.mxu1 %v1308_v0 }
  0xc5   : > { %1123 = vmatmul.mubr.msk.bf16.vlgmr.msra.gmra.mrb[4].mxu0 %vm296_vm12, %v1119_v4 }
  0xc6   : > { %985 = vmatprep.mubr.f32.mxu0 %v1317_v17 }
  0xc8   : > { %1138 = vmatmul.mubr.msk.bf16.vlgmr.msra.gmra.mrb[0].mxu1 %vm296_vm12, %v1136_v16 }
 0x113   : > { %v1010_v49 = vpop.permute.xlu1 %1009 }
 0x184   : > { %v474_v0 = vpop.f32.mrb[0].mxu0 }
 0x185   : > { %v476_v19 = vpop.f32.mrb[1].mxu0 }
 0x186   : > { %v478_v20 = vpop.f32.mrb[2].mxu0 }
 0x187   : > { %v479_v21 = vpop.f32.mrb[3].mxu0 }
 0x198   : > { %v581_v22 = vpop.f32.mrb[4].mxu0 }
 0x199   : > { %v583_v23 = vpop.f32.mrb[5].mxu0 }
 0x19a   : > { %v585_v24 = vpop.f32.mrb[6].mxu0 }
 0x19b   : > { %v586_v25 = vpop.f32.mrb[7].mxu0  ;;  %v889_v26 = vpop.f32.mrb[0].mxu1 }
 0x19c   : > { %v1149_v27 = vadd.f32 %v889_v26, %v581_v22  ;;  %v891_v28 = vpop.f32.mrb[1].mxu1 }
 0x19d   : > { %v1150_v29 = vadd.f32 %v891_v28, %v583_v23  ;;  %v893_v30 = vpop.f32.mrb[2].mxu1 }
 0x19e   : > { %v900_v31 = vrot.slane %v1149_v27, 4  ;;  %v894_v32 = vpop.f32.mrb[3].mxu1 }
 0x19f   : > { %v901_v34 = vrot.slane %v1150_v29, 4 }
 0x1a0   : > { %v905_v35 = vsel %vm904_vm4, %v474_v0, %v900_v31 }
 0x1a1   : > { %v906_v36 = vsel %vm904_vm4, %v476_v19, %v901_v34  ;;  %v913_v37 = vadd.f32 %v911_v33, %v905_v35 }
 0x1a2   : > { %v914_v38 = vadd.f32 %v911_v33, %v906_v36 }
 0x1a3   : > { %v915_v40 = vmul.f32 %v913_v37, %v913_v37 }
 0x1a4   : > { %v916_v39 = vmul.f32 %v914_v38, %v914_v38 }
 0x1a6   : > { %921 = vmatprep.subr.mxu0 %v916_v39 }
 0x1a7   : > { %922 = vmatpush1.msra.mxu0 %v915_v40 }
 0x1a8   : > { %1139 = vmatmul.mubr.msk.f32.vlgmr.msra.gmra.mrb[8].mxu0 %vm917_vm5, %v1318_v41 }
 0x27b   : > { %v987_v42 = vpop.f32.mrb[8].mxu0 }
 0x27c   : > { %v992_v43 = vmax.f32 %v987_v42, 1e-24  ;;  %v989_v44 = vpop.f32.mrb[9].mxu0 }
 0x27d   : > { %v993_v45 = vmax.f32 %v989_v44, 1e-24 }
 0x27e   : > { %1232 = vrsqrt.f32 %v992_v43 }
 0x27f   : > { %1234 = vrsqrt.f32 %v993_v45 }
 0x288   : > { %v1233_v46 = vpop.eup %1232 }
 0x289   : > { %v1235_v47 = vpop.eup %1234  ;;  %v999_v48 = vrot.slane %v1233_v46, %v1430_v12 }
 0x28a   : > { %v1003_v50 = vrot.slane %v1235_v47, %v1430_v12 }
 0x28b   : > { %v1004_v51 = vmul.f32 %v999_v48, %v913_v37 }
 0x28c   : > { %v1005_v52 = vmul.f32 %v1003_v50, %v914_v38 }
 0x28d   : > { %v1012_v53 = vmul.f32 %v1010_v49, %v1004_v51 }
 0x28e   : > { %v1013_v54 = vmul.f32 %v1010_v49, %v1005_v52 }
 0x28f   : > { %v1140_v55 = vmul.f32 -1.442695, %v1012_v53 }
 0x290   : > { %v1141_v56 = vmul.f32 -1.442695, %v1013_v54 }
 0x291   : > { %1236 = vpow2.f32 %v1140_v55 }
 0x292   : > { %1238 = vpow2.f32 %v1141_v56 }
 0x29b   : > { %v1237_v57 = vpop.eup %1236 }
 0x29c   : > { %v1239_v58 = vpop.eup %1238  ;;  %v1020_v59 = vadd.f32 1.0, %v1237_v57 }
 0x29d   : > { %v1021_v60 = vadd.f32 1.0, %v1239_v58 }
 0x29e   : > { %1240 = vrcp.f32 %v1020_v59 }
 0x29f   : > { %1242 = vrcp.f32 %v1021_v60 }
 0x2a8   : > { %v1241_v12 = vpop.eup %1240 }
 0x2a9   : > { %v1243_v61 = vpop.eup %1242  ;;  %v1026_v62 = vmul.f32 %v1241_v12, %v1012_v53 }
 0x2aa   : > { %v1027_v63 = vmul.f32 %v1243_v61, %v1013_v54 }
 0x2ab   : > { %1028 = vst [vmem:[%s217_s13] sm:$0xff] %v1026_v62 }
 0x2ac   : > { %1029 = vst [vmem:[%s217_s13 + $0x8] sm:$0xff] %v1027_v63 }
 0x2ad   : > { %1257 = shalt.err (!%p1254_p3)
}
 0x2ae   : > { %s1258_s6 = scalar_lea.hbm %s1550_s17, 256  ;;  %s1262_s9 = scalar_lea.hbm %s1597_s5, 512 }
 0x2af   : > { %p1259_p4 = scmp.ne.s32.totalorder %s1550_s17, %s1258_s6  ;;  %p1263_p9 = scmp.lt.u32.totalorder %s1550_s17, %s1597_s5 }
 0x2b0   : > { %p1264_p10 = scmp.lt.u32.totalorder %s1262_s9, %s1258_s6  ;;  %p1266_p12 = scmp.lt.u32.totalorder %s1258_s6, %s1550_s17 }
 0x2b1   : > { %p1260_p7 = pnand %p1259_p4, %p1388_p5 }
 0x2b2   : > { %p1265_p11 = por %p1264_p10, %p1263_p9 }
 0x2b3   : > { %p1261_p8 = pneg %p1260_p7 }
 0x2b4   : > { %p1267_p13 = por %p1266_p12, %p1265_p11 }
 0x2b6   : > { %p1268_p0 = pnand %p1267_p13, %p1261_p8 }
 0x2b8   : > { %1271 = shalt.err (!%p1268_p0)
}
 0x2b9   : > { %1179 = dma.vmem_to_hbm [thread:$0]  (%p1388_p5), %s1552_s14, 256, %s1550_s17, %s1031_s23  }
 0x2ba PF: > { %p1185_p1 = scmp.ge.s32.totalorder %s1306_s21, 2  ;;  %s1057_s12 = sand.u32 1, %s1294_s18  }
 0x2bb   : > { %s1058_s13 = scalar_lea.sflag [#allocation3], %s1057_s12 }
 0x2bc   : > { %p1182_p2 = pnand %p1185_p1, %p1392_p6 }
 0x2be   : > { %1289 = dma.done.wait (!%p1182_p2), %s1058_s13, 256  }
 0x2bf   : > { %1291 = vsyncadd (!%p1182_p2), %s1058_s13, 4294967040  ;;  %p15_p3 = scmp.ge.s32.totalorder %s1375_s24, 4   ;;  %s1608_s18 = smov %s1298_s19 }
 0x2c0   : > { %s1609_s19 = smov %s1302_s20  ;;  %s1610_s20 = smov %s1386_s27 }
 0x2c1   : > { %s1611_s21 = smov %s1375_s24  ;;  %17 = sbr.rel (!%p15_p3) target bundleno = 3 (0x3), region = 83 }
 0x2c8   :  { %1063 = vsyncpa [#allocation3], 1 }
 0x2c9   :  { %1065 = vsyncpa [#allocation3 + $0x1], 1 }

</bundles_post_ra>
